<compile_context>
chip_gen: v7x
topology: tpu7x:2x2x1
jax: 0.10.0
libtpu: 0.0.40
codegen_flags: <defaults>
</compile_context>

<pallas_src>
import functools

import jax
import jax.numpy as jnp
from jax.experimental import pallas as pl
from jax.experimental.pallas import tpu as pltpu


# ---------------------------------------------------------------------------
# Kernel
# ---------------------------------------------------------------------------
def _channel_attention_kernel(x_ref, w1t_ref, w2t_ref, o_ref, acc_ref, *,
                              hw_total, needs_mask):
    """acc_ref: (2*Nb, C) f32 scratch; rows [:Nb] running sum, [Nb:] running max."""
    k = pl.program_id(1)
    nb = o_ref.shape[0]
    c = o_ref.shape[1]
    hw_blk = x_ref.shape[-1]

    x_raw = x_ref[...]                                          # (Nb, C, hw_blk)

    # ---- max path: reduce in the input dtype (exact); mask padded lanes ----
    if needs_mask:
        lane = (jax.lax.broadcasted_iota(jnp.int32, x_raw.shape, 2)
                + k * hw_blk)
        neg_inf = jnp.asarray(-jnp.inf, dtype=x_raw.dtype)
        x_for_max = jnp.where(lane < hw_total, x_raw, neg_inf)
    else:
        x_for_max = x_raw
    tile_max = jnp.max(x_for_max, axis=-1).astype(jnp.float32)  # (Nb, C)

    # ---- sum path: f32 accumulate (zero padding is harmless for the sum) ----
    tile_sum = jnp.sum(x_raw.astype(jnp.float32), axis=-1)      # (Nb, C)

    @pl.when(k == 0)
    def _():
        acc_ref[pl.ds(0, nb), :] = jnp.zeros((nb, c), jnp.float32)
        acc_ref[pl.ds(nb, nb), :] = jnp.full((nb, c), -jnp.inf, jnp.float32)

    acc_ref[pl.ds(0, nb), :] = acc_ref[pl.ds(0, nb), :] + tile_sum
    acc_ref[pl.ds(nb, nb), :] = jnp.maximum(acc_ref[pl.ds(nb, nb), :], tile_max)

    @pl.when(k == pl.num_programs(1) - 1)
    def _():
        # Scale the sum rows to averages with a per-row select (pure VPU),
        # keeping `pooled` a single contiguous read of the scratch (no concat).
        row = jax.lax.broadcasted_iota(jnp.int32, (2 * nb, 1), 0)
        scale = jnp.where(row < nb, 1.0 / hw_total, 1.0)
        pooled = acc_ref[...] * scale                            # (2*Nb, C)

        # Fused shared-MLP: ONE matmul pair for both pooling paths.
        h = jnp.maximum(
            jnp.dot(pooled, w1t_ref[...],
                    preferred_element_type=jnp.float32), 0.0)    # (2*Nb, Ch)
        y = jnp.dot(h, w2t_ref[...],
                    preferred_element_type=jnp.float32)          # (2*Nb, C)
        out = jax.nn.sigmoid(y[:nb, :] + y[nb:, :])              # (Nb, C)
        o_ref[...] = out.astype(o_ref.dtype)


# ---------------------------------------------------------------------------
# Tiling heuristics (dtype- and generation-aware)
# ---------------------------------------------------------------------------
def _vmem_budget():
    """VMEM budgets per chip generation (v7x: 64 MiB/TC; v5e/v6e: 128 MiB)."""
    mib = 1024 * 1024
    try:
        cap = pltpu.get_tpu_info().vmem_capacity_bytes
    except Exception:  # conservative fallback if the query is unavailable
        cap = 128 * mib
    multi_core = cap <= 80 * mib          # v7x: 2 TensorCores per chip
    vmem_limit = min(cap // 2, 64 * mib)  # 32 MiB on v7x, 64 MiB on v5e/v6e
    max_block_bytes = vmem_limit // 4     # headroom for 2x double-buffered x
    return vmem_limit, max_block_bytes, multi_core


def _pick_block_n(n, c, itemsize, max_block_bytes, multi_core):
    """Batch tile: multiple of 8 or == N (BlockSpec rule), divides N, and keeps
    block_n*C*128*itemsize within the budget. On 2-TC chips prefer an even
    number (>=2) of batch grid steps so both cores are load-balanced."""
    cands = [d for d in range(1, n + 1)
             if n % d == 0 and (d % 8 == 0 or d == n)]
    fit = [d for d in cands if d * c * 128 * itemsize <= max_block_bytes]
    if not fit:
        fit = [min(cands)]
    if multi_core:
        even = [d for d in fit if (n // d) >= 2 and (n // d) % 2 == 0]
        if even:
            return max(even)
        multi = [d for d in fit if (n // d) >= 2]
        if multi:
            return max(multi)
    return max(fit)


def _pick_hw_tiling(hw, c, block_n, itemsize, max_block_bytes):
    """Return (hw_blk, hw_padded). If the full HW row fits the budget use it
    unsplit (legal even when hw % 128 != 0 since it is the full dim);
    otherwise tile by a multiple of 128 and pad HW up to a tile multiple."""
    if block_n * c * hw * itemsize <= max_block_bytes:
        return hw, hw
    cap = max(128, (max_block_bytes // (block_n * c * itemsize)) // 128 * 128)
    hw_blk = min(cap, pl.cdiv(hw, 128) * 128)
    hw_pad = pl.cdiv(hw, hw_blk) * hw_blk
    return hw_blk, hw_pad


# ---------------------------------------------------------------------------
# Wrapper
# ---------------------------------------------------------------------------
def channel_attention(x, w1, w2):
    """x: (N, C, H, W); w1: (Ch, C) = 1x1 conv1 weight squeezed; w2: (C, Ch).

    Returns sigmoid(MLP(avgpool(x)) + MLP(maxpool(x))) with shape (N, C, 1, 1),
    matching the PyTorch module's forward output.
    """
    n, c, h, w = x.shape
    ch = w1.shape[0]
    hw = h * w
    itemsize = jnp.dtype(x.dtype).itemsize

    vmem_limit, max_block_bytes, multi_core = _vmem_budget()
    block_n = _pick_block_n(n, c, itemsize, max_block_bytes, multi_core)
    hw_blk, hw_pad = _pick_hw_tiling(hw, c, block_n, itemsize, max_block_bytes)

    x_flat = x.reshape(n, c, hw)
    if hw_pad != hw:
        # zero-pad the spatial axis: safe for the sum path, masked for max.
        x_flat = jnp.pad(x_flat, ((0, 0), (0, 0), (0, hw_pad - hw)))

    w1t = jnp.transpose(w1)   # (C, Ch)
    w2t = jnp.transpose(w2)   # (Ch, C)

    kernel = functools.partial(_channel_attention_kernel,
                               hw_total=hw, needs_mask=(hw_pad != hw))

    cost = pl.CostEstimate(
        flops=int(2 * n * c * hw + 8 * n * c * ch),
        transcendentals=int(n * c),
        bytes_accessed=int(n * c * hw * itemsize + 2 * c * ch * 4
                           + n * c * itemsize),
    )

    out = pl.pallas_call(
        kernel,
        out_shape=jax.ShapeDtypeStruct((n, c), x.dtype),
        grid_spec=pltpu.PrefetchScalarGridSpec(
            num_scalar_prefetch=0,
            grid=(n // block_n, hw_pad // hw_blk),       # HW (reduction) last
            in_specs=[
                pl.BlockSpec((block_n, c, hw_blk), lambda i, k: (i, 0, k)),
                pl.BlockSpec((c, ch), lambda i, k: (0, 0)),
                pl.BlockSpec((ch, c), lambda i, k: (0, 0)),
            ],
            out_specs=pl.BlockSpec((block_n, c), lambda i, k: (i, 0)),
            scratch_shapes=[
                pltpu.VMEM((2 * block_n, c), jnp.float32),   # [sum ; max]
            ],
        ),
        compiler_params=pltpu.CompilerParams(
            dimension_semantics=("parallel", "arbitrary"),
            vmem_limit_bytes=vmem_limit,
        ),
        cost_estimate=cost,
    )(x_flat, w1t, w2t)
    return out.reshape(n, c, 1, 1)


# ---------------------------------------------------------------------------
# Pure-JAX reference (mirrors the PyTorch forward)
# ---------------------------------------------------------------------------
def _reference(x, w1, w2):
    avg = jnp.mean(x, axis=(2, 3))                         # (N, C)
    mx = jnp.max(x, axis=(2, 3))                           # (N, C)

    def mlp(p):
        hid = jnp.maximum(p @ w1.T, 0.0)                   # (N, Ch)
        return hid @ w2.T                                  # (N, C)

    return jax.nn.sigmoid(mlp(avg) + mlp(mx))[:, :, None, None]


if __name__ == "__main__":
    # module config: channel=64, ratio=16 -> hidden = 4
    N, C, H, W = 2, 64, 16, 16
    RATIO = 16
    CH = C // RATIO

    key = jax.random.PRNGKey(0)
    kx, k1, k2 = jax.random.split(key, 3)

    x = jax.random.normal(kx, (N, C, H, W), dtype=jnp.float32)

    # deterministic init mimicking PyTorch Conv2d kaiming_uniform default
    # (1x1 convs, no bias): weights (Ch, C, 1, 1) / (C, Ch, 1, 1), squeezed.
    bound1 = (1.0 / C) ** 0.5
    bound2 = (1.0 / CH) ** 0.5
    w1 = jax.random.uniform(k1, (CH, C), jnp.float32, -bound1, bound1)
    w2 = jax.random.uniform(k2, (C, CH), jnp.float32, -bound2, bound2)

    out = channel_attention(x, w1, w2)
    out = jax.block_until_ready(out)

    ref = _reference(x, w1, w2)
    assert out.shape == (N, C, 1, 1)
    assert jnp.allclose(out, ref, atol=1e-5, rtol=1e-5)

    print("KERNEL_OK")
</pallas_src>

<mosaic_0001>
module attributes {stable_mosaic.version = 11 : i64} {
  func.func @_channel_attention_kernel(%arg0: i32, %arg1: i32, %arg2: memref<2x64x256xf32, #tpu.memory_space<vmem>>, %arg3: memref<64x4xf32, #tpu.memory_space<vmem>>, %arg4: memref<4x64xf32, #tpu.memory_space<vmem>>, %arg5: memref<2x64xf32, #tpu.memory_space<vmem>>, %arg6: memref<4x64xf32, #tpu.memory_space<vmem>>) attributes {dimension_semantics = [#tpu.dimension_semantics<parallel>, #tpu.dimension_semantics<arbitrary>], iteration_bounds = array<i64: 1, 1>, scalar_prefetch = 0 : i64, scratch_operands = 1 : i64, tpu.core_type = #tpu.core_type<tc>, window_params = [{transform_indices = @transform_0, window_bounds = array<i64: 2, 64, 256>}, {pipeline_mode = #tpu.pipeline_mode<synchronous>, transform_indices = @transform_1, window_bounds = array<i64: 64, 4>}, {pipeline_mode = #tpu.pipeline_mode<synchronous>, transform_indices = @transform_2, window_bounds = array<i64: 4, 64>}, {transform_indices = @transform_3, window_bounds = array<i64: 2, 64>}]} {
    %c0 = arith.constant 0 : index
    %c0_0 = arith.constant 0 : index
    %c0_1 = arith.constant 0 : index
    %0 = vector.load %arg2[%c0, %c0_0, %c0_1] : memref<2x64x256xf32, #tpu.memory_space<vmem>>, vector<2x64x256xf32>
    %cst = arith.constant dense<0xFF800000> : vector<2x64xf32>
    %1 = vector.multi_reduction <maximumf>, %0, %cst [2] : vector<2x64x256xf32> to vector<2x64xf32>
    %cst_2 = arith.constant dense<0.000000e+00> : vector<2x64xf32>
    %2 = vector.multi_reduction <add>, %0, %cst_2 [2] : vector<2x64x256xf32> to vector<2x64xf32>
    %c0_i32 = arith.constant 0 : i32
    %3 = arith.cmpi eq, %arg1, %c0_i32 : i32
    %4 = arith.extui %3 : i1 to i32
    %c0_i32_3 = arith.constant 0 : i32
    %5 = arith.cmpi ne, %4, %c0_i32_3 : i32
    scf.if %5 {
      %cst_13 = arith.constant 0.000000e+00 : f32
      %15 = vector.broadcast %cst_13 : f32 to vector<2x64xf32>
      %c0_14 = arith.constant 0 : index
      %c0_15 = arith.constant 0 : index
      %16 = vector.load %arg6[%c0_14, %c0_15] : memref<4x64xf32, #tpu.memory_space<vmem>>, vector<2x64xf32>
      tpu.vector_store %arg6[%c0_14, %c0_15], %15 {strides = array<i32>} : memref<4x64xf32, #tpu.memory_space<vmem>>, vector<2x64xf32>,
      %cst_16 = arith.constant 0xFF800000 : f32
      %17 = vector.broadcast %cst_16 : f32 to vector<2x64xf32>
      %c2_17 = arith.constant 2 : index
      %c0_18 = arith.constant 0 : index
      %18 = vector.load %arg6[%c2_17, %c0_18] : memref<4x64xf32, #tpu.memory_space<vmem>>, vector<2x64xf32>
      tpu.vector_store %arg6[%c2_17, %c0_18], %17 {strides = array<i32>} : memref<4x64xf32, #tpu.memory_space<vmem>>, vector<2x64xf32>,
    } else {
    }
    %c0_4 = arith.constant 0 : index
    %c0_5 = arith.constant 0 : index
    %6 = vector.load %arg6[%c0_4, %c0_5] : memref<4x64xf32, #tpu.memory_space<vmem>>, vector<2x64xf32>
    %7 = arith.addf %6, %2 : vector<2x64xf32>
    %c0_6 = arith.constant 0 : index
    %c0_7 = arith.constant 0 : index
    %8 = vector.load %arg6[%c0_6, %c0_7] : memref<4x64xf32, #tpu.memory_space<vmem>>, vector<2x64xf32>
    tpu.vector_store %arg6[%c0_6, %c0_7], %7 {strides = array<i32>} : memref<4x64xf32, #tpu.memory_space<vmem>>, vector<2x64xf32>,
    %c2 = arith.constant 2 : index
    %c0_8 = arith.constant 0 : index
    %9 = vector.load %arg6[%c2, %c0_8] : memref<4x64xf32, #tpu.memory_space<vmem>>, vector<2x64xf32>
    %10 = arith.maximumf %9, %1 : vector<2x64xf32>
    %c2_9 = arith.constant 2 : index
    %c0_10 = arith.constant 0 : index
    %11 = vector.load %arg6[%c2_9, %c0_10] : memref<4x64xf32, #tpu.memory_space<vmem>>, vector<2x64xf32>
    tpu.vector_store %arg6[%c2_9, %c0_10], %10 {strides = array<i32>} : memref<4x64xf32, #tpu.memory_space<vmem>>, vector<2x64xf32>,
    %c0_i32_11 = arith.constant 0 : i32
    %12 = arith.cmpi eq, %arg1, %c0_i32_11 : i32
    %13 = arith.extui %12 : i1 to i32
    %c0_i32_12 = arith.constant 0 : i32
    %14 = arith.cmpi ne, %13, %c0_i32_12 : i32
    scf.if %14 {
      %15 = tpu.iota {dimensions = array<i32: 0>} : vector<4x1xi32>
      %c2_i32 = arith.constant 2 : i32
      %16 = vector.broadcast %c2_i32 : i32 to vector<4x1xi32>
      %17 = arith.cmpi slt, %15, %16 : vector<4x1xi32>
      %cst_13 = arith.constant 3.906250e-03 : f32
      %cst_14 = arith.constant 1.000000e+00 : f32
      %18 = vector.broadcast %cst_13 : f32 to vector<4x1xf32>
      %19 = vector.broadcast %cst_14 : f32 to vector<4x1xf32>
      %20 = arith.select %17, %18, %19 : vector<4x1xi1>, vector<4x1xf32>
      %c0_15 = arith.constant 0 : index
      %c0_16 = arith.constant 0 : index
      %21 = vector.load %arg6[%c0_15, %c0_16] : memref<4x64xf32, #tpu.memory_space<vmem>>, vector<4x64xf32>
      %22 = vector.broadcast %20 : vector<4x1xf32> to vector<4x64xf32>
      %23 = arith.mulf %21, %22 : vector<4x64xf32>
      %c0_17 = arith.constant 0 : index
      %c0_18 = arith.constant 0 : index
      %24 = vector.load %arg3[%c0_17, %c0_18] : memref<64x4xf32, #tpu.memory_space<vmem>>, vector<64x4xf32>
      %cst_19 = arith.constant dense<0.000000e+00> : vector<4x4xf32>
      %25 = tpu.matmul %23, %24, %cst_19 {dimension_numbers = #tpu.dot_dimension_numbers<[1], [0], [0], [1], [0, 0, 1, 1], [], []>} : vector<4x64xf32>, vector<64x4xf32>, vector<4x4xf32> -> vector<4x4xf32>
      %cst_20 = arith.constant 0.000000e+00 : f32
      %26 = vector.broadcast %cst_20 : f32 to vector<4x4xf32>
      %27 = arith.maximumf %25, %26 : vector<4x4xf32>
      %c0_21 = arith.constant 0 : index
      %c0_22 = arith.constant 0 : index
      %28 = vector.load %arg4[%c0_21, %c0_22] : memref<4x64xf32, #tpu.memory_space<vmem>>, vector<4x64xf32>
      %cst_23 = arith.constant dense<0.000000e+00> : vector<4x64xf32>
      %29 = tpu.matmul %27, %28, %cst_23 {dimension_numbers = #tpu.dot_dimension_numbers<[1], [0], [0], [1], [0, 0, 1, 1], [], []>} : vector<4x4xf32>, vector<4x64xf32>, vector<4x64xf32> -> vector<4x64xf32>
      %30 = vector.extract_strided_slice %29 {offsets = [0, 0], sizes = [2, 64], strides = [1, 1]} : vector<4x64xf32> to vector<2x64xf32>
      %31 = vector.extract_strided_slice %29 {offsets = [2, 0], sizes = [2, 64], strides = [1, 1]} : vector<4x64xf32> to vector<2x64xf32>
      %32 = arith.addf %30, %31 : vector<2x64xf32>
      %33 = arith.negf %32 : vector<2x64xf32>
      %34 = math.exp %33 : vector<2x64xf32>
      %cst_24 = arith.constant 1.000000e+00 : f32
      %35 = vector.broadcast %cst_24 : f32 to vector<2x64xf32>
      %36 = arith.addf %35, %34 : vector<2x64xf32>
      %37 = arith.divf %35, %36 : vector<2x64xf32>
      %c0_25 = arith.constant 0 : index
      %c0_26 = arith.constant 0 : index
      %38 = vector.load %arg5[%c0_25, %c0_26] : memref<2x64xf32, #tpu.memory_space<vmem>>, vector<2x64xf32>
      tpu.vector_store %arg5[%c0_25, %c0_26], %37 {strides = array<i32>} : memref<2x64xf32, #tpu.memory_space<vmem>>, vector<2x64xf32>,
    } else {
    }
    return
  }
  func.func @transform_0(%arg0: i32, %arg1: i32) -> (i32, i32, i32) {
    %c0_i32 = arith.constant 0 : i32
    %c0_i32_0 = arith.constant 0 : i32
    return %arg0, %c0_i32, %arg1 : i32, i32, i32
  }
  func.func @transform_1(%arg0: i32, %arg1: i32) -> (i32, i32) {
    %c0_i32 = arith.constant 0 : i32
    %c0_i32_0 = arith.constant 0 : i32
    %c0_i32_1 = arith.constant 0 : i32
    return %c0_i32, %c0_i32_0 : i32, i32
  }
  func.func @transform_2(%arg0: i32, %arg1: i32) -> (i32, i32) {
    %c0_i32 = arith.constant 0 : i32
    %c0_i32_0 = arith.constant 0 : i32
    %c0_i32_1 = arith.constant 0 : i32
    return %c0_i32, %c0_i32_0 : i32, i32
  }
  func.func @transform_3(%arg0: i32, %arg1: i32) -> (i32, i32) {
    %c0_i32 = arith.constant 0 : i32
    %c0_i32_0 = arith.constant 0 : i32
    return %arg0, %c0_i32 : i32, i32
  }
}

</mosaic_0001>

<bundles_post_ra>
// kernel: tpu_custom_call.1
= control target key start
LH: loop header
LB: loop body
LE: loop exit
PB: predicated region body
PF: predicated region fallthrough
CT: control target
= control target key end

     0   :  { %8 = vsyncpa [#allocation4], 0  ;;  %s994_s0 = inlined_call_operand.hbm [shape: f32[2,64,256], index: 0, kind: input, shape index: {}]   ;;  %s995_s1 = inlined_call_operand.hbm [shape: f32[64,4], index: 1, kind: input, shape index: {}]   ;;  %s996_s2 = inlined_call_operand.hbm [shape: f32[4,64], index: 2, kind: input, shape index: {}]   ;;  %s997_s3 = inlined_call_operand.hbm [shape: f32[2,64], index: 3, kind: output, shape index: {}]  }
   0x1   :  { %9 = vsyncpa [#allocation7], 0 }
   0x2   :  { %10 = vsyncpa [#allocation5], 0  ;;  %s765_s12 = smov [#allocation6]   ;;  %s671_s16 = scalar_lea.hbm %s995_s1, 1024 }
   0x3   :  { %s28_s13 = sshll.u32 %s765_s12, 4  ;;  %p672_p0 = scmp.ne.s32.totalorder %s995_s1, %s671_s16  ;;  %s29_s13 = int_to_ptr.vmem [resolvable:$true] %s28_s13 }
   0x4   :  { %p675_p1 = scmp.lt.u32.totalorder %s671_s16, %s995_s1 }
   0x6   :  { %p677_p2 = pnand %p675_p1, %p672_p0 }
   0x8   :  { %680 = shalt.err (!%p677_p2)
}
   0x9   :  { %s681_s21 = scalar_lea.vmem %s29_s13, 1024  ;;  %p686_p4 = scmp.lt.s32.totalorder %s29_s13, %s29_s13 }
   0xa   :  { %p682_p3 = scmp.ne.s32.totalorder %s29_s13, %s681_s21  ;;  %p687_p5 = scmp.lt.s32.totalorder %s681_s21, %s681_s21 }
   0xc   :  { %p688_p6 = por %p687_p5, %p686_p4 }
   0xe   :  { %p689_p7 = pnand %p688_p6, %p682_p3 }
  0x10   :  { %692 = shalt.err (!%p689_p7)
}
  0x11   :  { %s766_s22 = smov 128   ;;  %s767_s23 = smov 8  }
  0x12   :  { %34 = dma.hbm_to_vmem [thread:$0]  %s995_s1, 1024, %s29_s13, [#allocation7], %s766_s22, %s766_s22, %s767_s23  }
  0x13   :  { %s768_s26 = smov [#allocation3]   ;;  %s693_s30 = scalar_lea.hbm %s994_s0, 4096 }
  0x14   :  { %s16_s27 = sshll.u32 %s768_s26, 4  ;;  %p694_p8 = scmp.ne.s32.totalorder %s994_s0, %s693_s30  ;;  %s17_s27 = int_to_ptr.vmem [resolvable:$true] %s16_s27 }
  0x15   :  { %p697_p9 = scmp.lt.u32.totalorder %s693_s30, %s994_s0 }
  0x17   :  { %p699_p10 = pnand %p697_p9, %p694_p8 }
  0x19   :  { %702 = shalt.err (!%p699_p10)
}
  0x1a   :  { %s703_s8 = scalar_lea.vmem %s17_s27, 4096  ;;  %p708_p12 = scmp.lt.s32.totalorder %s17_s27, %s17_s27 }
  0x1b   :  { %p704_p11 = scmp.ne.s32.totalorder %s17_s27, %s703_s8  ;;  %p709_p13 = scmp.lt.s32.totalorder %s703_s8, %s703_s8 }
  0x1d   :  { %p710_p0 = por %p709_p13, %p708_p12 }
  0x1f   :  { %p711_p1 = pnand %p710_p0, %p704_p11 }
  0x21   :  { %714 = shalt.err (!%p711_p1)
}
  0x22   :  { %s769_s1 = smov 256   ;;  %s770_s9 = smov 16  }
  0x23   :  { %22 = dma.hbm_to_vmem [thread:$0]  %s994_s0, 4096, %s17_s27, [#allocation4], %s769_s1, %s769_s1, %s770_s9  }
  0x24   :  { %s771_s12 = smov [#allocation8]   ;;  %s715_s16 = scalar_lea.hbm %s996_s2, 64 }
  0x25   :  { %s41_s13 = sshll.u32 %s771_s12, 4  ;;  %p716_p2 = scmp.ne.s32.totalorder %s996_s2, %s715_s16  ;;  %s42_s13 = int_to_ptr.vmem [resolvable:$true] %s41_s13 }
  0x26   :  { %p719_p3 = scmp.lt.u32.totalorder %s715_s16, %s996_s2 }
  0x28   :  { %p721_p4 = pnand %p719_p3, %p716_p2 }
  0x2a   :  { %724 = shalt.err (!%p721_p4)
}
  0x2b   :  { %s725_s21 = scalar_lea.vmem %s42_s13, 64  ;;  %p730_p6 = scmp.lt.s32.totalorder %s42_s13, %s42_s13 }
  0x2c   :  { %p726_p5 = scmp.ne.s32.totalorder %s42_s13, %s725_s21  ;;  %p731_p7 = scmp.lt.s32.totalorder %s725_s21, %s725_s21 }
  0x2e   :  { %p732_p8 = por %p731_p7, %p730_p6 }
  0x30   :  { %p733_p9 = pnand %p732_p8, %p726_p5 }
  0x32   :  { %736 = shalt.err (!%p733_p9)
}
  0x33   :  { %44 = dma.hbm_to_vmem [thread:$0]  %s996_s2, 64, %s42_s13, [#allocation7]  }
  0x34   :  { %759 = dma.done.wait [#allocation4], 4096  }
  0x35   :  { %760 = vsyncadd [#allocation4], 4294963200 }
  0x36   :  { %761 = dma.done.wait [#allocation7], 1088  }
  0x37   :  { %762 = vsyncadd [#allocation7], 4294966208  ;;  %v70_v0 = vld [vmem:[#allocation3 + $0x80] sm:$0xff]  ;;  %v71_v1 = vld [vmem:[#allocation3 + $0x88] sm:$0xff]  ;;  %vm186_vm0 = vcmask 517120   ;;  %vm775_vm1 = vmmov 0  }
  0x38   :  { %v54_v2 = vld [vmem:[#allocation3] sm:$0xff]  ;;  %v110_v3 = vmax.f32 %v70_v0, %v71_v1  ;;  %v55_v4 = vld [vmem:[#allocation3 + $0x8] sm:$0xff]  ;;  %v72_v5 = vld [vmem:[#allocation3 + $0x90] sm:$0xff]  ;;  %v158_v15 = vadd.f32 %v71_v1, %v70_v0  ;;  %v772_v0 = vmov -inf   ;;  %v773_v1 = vmov 0.0   ;;  %s777_s2 = smov [#allocation9]  }
  0x39   :  { %v73_v6 = vld [vmem:[#allocation3 + $0x98] sm:$0xff]  ;;  %v86_v7 = vmax.f32 %v54_v2, %v55_v4  ;;  %v56_v8 = vld [vmem:[#allocation3 + $0x10] sm:$0xff]  ;;  %v134_v13 = vadd.f32 %v55_v4, %v54_v2  ;;  %v74_v16 = vld [vmem:[#allocation3 + $0xa0] sm:$0xff]  ;;  %188 = vst.msk [vmem:[#allocation2 + $0x2] sm:$0x3] %vm186_vm0, %v772_v0  ;;  %637 = vmatprep.subr.mxu1 %v773_v1  ;;  %634 = vmatprep.mubr.msk.f32.mxu0 %vm775_vm1, %v773_v1  ;;  %vm217_vm2 = vcmask 130112  }
  0x3a   :  { %v57_v9 = vld [vmem:[#allocation3 + $0x18] sm:$0xff]  ;;  %111 = vmax.xlane.f32.xlu1 %v110_v3  ;;  %v113_v10 = vmax.f32 %v72_v5, %v73_v6  ;;  %v161_v14 = vadd.f32 %v73_v6, %v72_v5  ;;  %v75_v17 = vld [vmem:[#allocation3 + $0xa8] sm:$0xff]  ;;  %v58_v18 = vld [vmem:[#allocation3 + $0x20] sm:$0xff]  ;;  %187 = vst.msk [vmem:[#allocation2] sm:$0x3] %vm186_vm0, %v773_v1  ;;  %v774_v5 = vmov 0.0|0.0   ;;  %639 = vmatprep.mubr.msk.f32.mxu1 %vm775_vm1, %v773_v1 }
  0x3b   :  { %87 = vmax.xlane.f32.xlu0 %v86_v7  ;;  %v89_v11 = vmax.f32 %v56_v8, %v57_v9  ;;  %v137_v12 = vadd.f32 %v57_v9, %v56_v8  ;;  %v59_v19 = vld [vmem:[#allocation3 + $0x28] sm:$0xff]  ;;  %v116_v20 = vmax.f32 %v74_v16, %v75_v17  ;;  %v164_v22 = vadd.f32 %v75_v17, %v74_v16  ;;  %v76_v24 = vld [vmem:[#allocation3 + $0xb0] sm:$0xff]  ;;  %v77_v25 = vld [vmem:[#allocation3 + $0xb8] sm:$0xff]  ;;  %s593_s23 = sshll.u32 %s777_s2, 4  ;;  %s594_s23 = int_to_ptr.vmem [resolvable:$true] %s593_s23 }
  0x3c   :  { %v92_v21 = vmax.f32 %v58_v18, %v59_v19  ;;  %v140_v23 = vadd.f32 %v59_v19, %v58_v18  ;;  %v60_v26 = vld [vmem:[#allocation3 + $0x30] sm:$0xff]  ;;  %v61_v27 = vld [vmem:[#allocation3 + $0x38] sm:$0xff]  ;;  %v119_v28 = vmax.f32 %v76_v24, %v77_v25  ;;  %v167_v30 = vadd.f32 %v77_v25, %v76_v24  ;;  %v78_v32 = vld [vmem:[#allocation3 + $0xc0] sm:$0xff]  ;;  %642 = vmatprep.subr.bf16.mxu0 %v774_v5  ;;  %s737_s24 = scalar_lea.vmem %s594_s23, 32  ;;  %p742_p11 = scmp.lt.s32.totalorder %s594_s23, %s594_s23 }
  0x3d   :  { %v95_v29 = vmax.f32 %v60_v26, %v61_v27  ;;  %v143_v31 = vadd.f32 %v61_v27, %v60_v26  ;;  %v79_v33 = vld [vmem:[#allocation3 + $0xc8] sm:$0xff]  ;;  %v62_v34 = vld [vmem:[#allocation3 + $0x40] sm:$0xff]  ;;  %v80_v40 = vld [vmem:[#allocation3 + $0xd0] sm:$0xff]  ;;  %vm224_vm3 = vcmask 195712   ;;  %vm231_vm4 = vcmask 261312   ;;  %p738_p10 = scmp.ne.s32.totalorder %s594_s23, %s737_s24  ;;  %p743_p12 = scmp.lt.s32.totalorder %s737_s24, %s737_s24 }
  0x3e   :  { %114 = vmax.xlane.f32.xlu1 %v113_v10  ;;  %v63_v35 = vld [vmem:[#allocation3 + $0x48] sm:$0xff]  ;;  %v122_v36 = vmax.f32 %v78_v32, %v79_v33  ;;  %v170_v38 = vadd.f32 %v79_v33, %v78_v32  ;;  %v81_v41 = vld [vmem:[#allocation3 + $0xd8] sm:$0xff]  ;;  %v64_v42 = vld [vmem:[#allocation3 + $0x50] sm:$0xff]  ;;  %v206_v32 = vlaneseq  ;;  %vm238_vm5 = vcmask 326912  }
  0x3f   :  { %90 = vmax.xlane.f32.xlu0 %v89_v11  ;;  %v98_v37 = vmax.f32 %v62_v34, %v63_v35  ;;  %v146_v39 = vadd.f32 %v63_v35, %v62_v34  ;;  %v65_v43 = vld [vmem:[#allocation3 + $0x58] sm:$0xff]  ;;  %v125_v44 = vmax.f32 %v80_v40, %v81_v41  ;;  %v173_v46 = vadd.f32 %v81_v41, %v80_v40  ;;  %v82_v48 = vld [vmem:[#allocation3 + $0xe0] sm:$0xff]  ;;  %v83_v49 = vld [vmem:[#allocation3 + $0xe8] sm:$0xff]  ;;  %p744_p13 = por %p743_p12, %p742_p11 }
  0x40   :  { %v101_v45 = vmax.f32 %v64_v42, %v65_v43  ;;  %v149_v47 = vadd.f32 %v65_v43, %v64_v42  ;;  %v66_v50 = vld [vmem:[#allocation3 + $0x60] sm:$0xff]  ;;  %v67_v51 = vld [vmem:[#allocation3 + $0x68] sm:$0xff]  ;;  %v128_v52 = vmax.f32 %v82_v48, %v83_v49  ;;  %v176_v54 = vadd.f32 %v83_v49, %v82_v48  ;;  %v84_v56 = vld [vmem:[#allocation3 + $0xf0] sm:$0xff] }
  0x41   :  { %v104_v53 = vmax.f32 %v66_v50, %v67_v51  ;;  %v152_v55 = vadd.f32 %v67_v51, %v66_v50  ;;  %v85_v57 = vld [vmem:[#allocation3 + $0xf8] sm:$0xff]  ;;  %v68_v58 = vld [vmem:[#allocation3 + $0x70] sm:$0xff]  ;;  %v414_v2 = vld [vmem:[#allocation6] sm:$0xff]  ;;  %v207_v35 = vand.u32 127, %v206_v32  ;;  %vm245_vm6 = vcmask 392512   ;;  %p745_p0 = pnand %p744_p13, %p738_p10 }
  0x42   :  { %138 = vadd.xlane.f32.xlu1 %v137_v12  ;;  %v69_v59 = vld [vmem:[#allocation3 + $0x78] sm:$0xff]  ;;  %v131_v60 = vmax.f32 %v84_v56, %v85_v57  ;;  %v179_v62 = vadd.f32 %v85_v57, %v84_v56  ;;  %v415_v3 = vld [vmem:[#allocation6 + $0x8] sm:$0xff]  ;;  %v416_v6 = vld [vmem:[#allocation6 + $0x10] sm:$0xff]  ;;  %vm252_vm7 = vcmask 458112   ;;  %vm259_vm8 = vcmask 523712  }
  0x43   :  { %135 = vadd.xlane.f32.xlu0 %v134_v13  ;;  %v107_v61 = vmax.f32 %v68_v58, %v69_v59  ;;  %v155_v63 = vadd.f32 %v69_v59, %v68_v58  ;;  %v643_v4 = vpack.c.bf16 %v415_v3, %v414_v2  ;;  %v417_v7 = vld [vmem:[#allocation6 + $0x18] sm:$0xff]  ;;  %v418_v9 = vld [vmem:[#allocation6 + $0x20] sm:$0xff]  ;;  %v419_v10 = vld [vmem:[#allocation6 + $0x28] sm:$0xff]  ;;  %v226_v41 = vadd.s32 4294967272, %v207_v35 }
  0x44   :  { %v646_v8 = vpack.c.bf16 %v417_v7, %v416_v6  ;;  %v649_v11 = vpack.c.bf16 %v419_v10, %v418_v9  ;;  %v420_v12 = vld [vmem:[#allocation6 + $0x30] sm:$0xff]  ;;  %v421_v13 = vld [vmem:[#allocation6 + $0x38] sm:$0xff]  ;;  %v233_v42 = vadd.s32 4294967264, %v207_v35  ;;  %vm300_vm9 = vcmask 1041409  }
  0x45   :  { %644 = vmatpush3.bf16.msra.mxu0 %v643_v4  ;;  %vm422_vm11 = vcmask 523264   ;;  %vm502_vm12 = vcmask 1043456   ;;  %vm498_vm13 = vcmask 31744  }
  0x46   :  { %162 = vadd.xlane.f32.xlu1 %v161_v14  ;;  %645 = vmatprep.subr.bf16.mxu0 %v774_v5  ;;  %v652_v14 = vpack.c.bf16 %v421_v13, %v420_v12 }
  0x47   :  { %159 = vadd.xlane.f32.xlu0 %v158_v15 }
  0x49   :  { %647 = vmatpush3.bf16.msra.mxu0 %v646_v8 }
  0x4a   :  { %117 = vmax.xlane.f32.xlu1 %v116_v20  ;;  %648 = vmatprep.subr.bf16.mxu0 %v774_v5 }
  0x4b   :  { %93 = vmax.xlane.f32.xlu0 %v92_v21 }
  0x4d   :  { %650 = vmatpush3.bf16.msra.mxu0 %v649_v11 }
  0x4e   :  { %165 = vadd.xlane.f32.xlu1 %v164_v22  ;;  %651 = vmatprep.subr.bf16.mxu0 %v774_v5 }
  0x4f   :  { %141 = vadd.xlane.f32.xlu0 %v140_v23 }
  0x51   :  { %653 = vmatpush3.bf16.msra.mxu0 %v652_v14 }
  0x52   :  { %120 = vmax.xlane.f32.xlu1 %v119_v28 }
  0x53   :  { %96 = vmax.xlane.f32.xlu0 %v95_v29 }
  0x56   :  { %168 = vadd.xlane.f32.xlu1 %v167_v30 }
  0x57   :  { %144 = vadd.xlane.f32.xlu0 %v143_v31 }
  0x5a   :  { %123 = vmax.xlane.f32.xlu1 %v122_v36 }
  0x5b   :  { %99 = vmax.xlane.f32.xlu0 %v98_v37  ;;  %v212_v37 = vadd.s32 4294967288, %v207_v35 }
  0x5e   :  { %171 = vadd.xlane.f32.xlu1 %v170_v38  ;;  %v876_v38 = vshrl.u32 %v206_v32, 7 }
  0x5f   :  { %147 = vadd.xlane.f32.xlu0 %v146_v39  ;;  %v219_v39 = vadd.s32 4294967280, %v207_v35 }
  0x60   :  { %v210_v48 = vsub.s32 %v207_v35, %v876_v38  ;;  %v888_v51 = vsub.s32 %v226_v41, %v876_v38  ;;  %vm410_vm10 = vcmp.lt.s32.totalorder %v876_v38, 2 }
  0x61   :  { %v222_v49 = vsub.s32 %v219_v39, %v876_v38 }
  0x62   :  { %126 = vmax.xlane.f32.xlu1 %v125_v44  ;;  %v240_v44 = vadd.s32 4294967256, %v207_v35 }
  0x63   :  { %102 = vmax.xlane.f32.xlu0 %v101_v45  ;;  %v247_v45 = vadd.s32 4294967248, %v207_v35 }
  0x66   :  { %174 = vadd.xlane.f32.xlu1 %v173_v46  ;;  %v215_v46 = vsub.s32 %v212_v37, %v876_v38 }
  0x67   :  { %150 = vadd.xlane.f32.xlu0 %v149_v47  ;;  %v254_v47 = vadd.s32 4294967240, %v207_v35 }
  0x69   :  { %v904_v58 = vsub.s32 %v254_v47, %v876_v38 }
  0x6a   :  { %129 = vmax.xlane.f32.xlu1 %v128_v52  ;;  %v891_v52 = vsub.s32 %v233_v42, %v876_v38 }
  0x6b   :  { %105 = vmax.xlane.f32.xlu0 %v104_v53 }
  0x6e   :  { %177 = vadd.xlane.f32.xlu1 %v176_v54  ;;  %v896_v54 = vsub.s32 %v240_v44, %v876_v38 }
  0x6f   :  { %153 = vadd.xlane.f32.xlu0 %v152_v55  ;;  %v899_v55 = vsub.s32 %v247_v45, %v876_v38 }
  0x72   :  { %132 = vmax.xlane.f32.xlu1 %v131_v60 }
  0x73   :  { %108 = vmax.xlane.f32.xlu0 %v107_v61 }
  0x76   :  { %180 = vadd.xlane.f32.xlu1 %v179_v62 }
  0x77   :  { %156 = vadd.xlane.f32.xlu0 %v155_v63 }
  0xc7   :  { %v836_v15 = vpop.xlane.xlu1 %111 }
  0xc8   :  { %v838_v16 = vpop.xlane.xlu0 %87  ;;  %v365_v0 = vrot.slane %v836_v15, %v210_v48 }
  0xc9   :  { %v326_v1 = vrot.slane %v838_v16, %v210_v48 }
  0xcb   :  { %v840_v17 = vpop.xlane.xlu1 %114 }
  0xcc   :  { %v842_v18 = vpop.xlane.xlu0 %90  ;;  %v369_v56 = vrot.slane %v840_v17, %v215_v46 }
  0xcd   :  { %v330_v57 = vrot.slane %v842_v18, %v215_v46 }
  0xce   :  { %v370_v8 = vsel %vm217_vm2, %v369_v56, %v365_v0 }
  0xcf   :  { %v844_v19 = vpop.xlane.xlu1 %138  ;;  %v331_v9 = vsel %vm217_vm2, %v330_v57, %v326_v1  ;;  %v189_v1 = vld [vmem:[#allocation2] sm:$0x3] }
  0xd0   :  { %v846_v20 = vpop.xlane.xlu0 %135  ;;  %v216_v59 = vrot.slane %v844_v19, %v215_v46 }
  0xd1   :  { %v211_v60 = vrot.slane %v846_v20, %v210_v48 }
  0xd3   :  { %v848_v21 = vpop.xlane.xlu1 %162  ;;  %v218_v11 = vsel %vm217_vm2, %v216_v59, %v211_v60 }
  0xd4   :  { %v850_v22 = vpop.xlane.xlu0 %159  ;;  %v268_v61 = vrot.slane %v848_v21, %v215_v46 }
  0xd5   :  { %v264_v62 = vrot.slane %v850_v22, %v210_v48  ;;  %v306_v48 = vld [vmem:[#allocation2 + $0x2] sm:$0x3] }
  0xd7   :  { %v852_v23 = vpop.xlane.xlu1 %117  ;;  %v269_v12 = vsel %vm217_vm2, %v268_v61, %v264_v62 }
  0xd8   :  { %v854_v24 = vpop.xlane.xlu0 %93  ;;  %v374_v2 = vrot.slane %v852_v23, %v222_v49 }
  0xd9   :  { %v335_v3 = vrot.slane %v854_v24, %v222_v49 }
  0xda   :  { %v375_v16 = vsel %vm224_vm3, %v374_v2, %v370_v8  ;;  %v497_v8 = vld [vmem:[#allocation8] sm:$0xf] }
  0xdb   :  { %v856_v25 = vpop.xlane.xlu1 %165  ;;  %v336_v17 = vsel %vm224_vm3, %v335_v3, %v331_v9  ;;  %638 = vmatpush3.msk.msra.mxu1 %vm502_vm12, %v497_v8 }
  0xdc   :  { %v858_v26 = vpop.xlane.xlu0 %141  ;;  %v273_v5 = vrot.slane %v856_v25, %v222_v49 }
  0xdd   :  { %v223_v6 = vrot.slane %v858_v26, %v222_v49 }
  0xde   :  { %v274_v21 = vsel %vm224_vm3, %v273_v5, %v269_v12  ;;  %v776_v5 = vmov 1.0  }
  0xdf   :  { %v860_v27 = vpop.xlane.xlu1 %120  ;;  %v225_v22 = vsel %vm224_vm3, %v223_v6, %v218_v11  ;;  %v411_v6 = vsel %vm410_vm10, 0.00390625, %v776_v5 }
  0xe0   :  { %v862_v28 = vpop.xlane.xlu0 %96  ;;  %v379_v7 = vrot.slane %v860_v27, %v888_v51 }
  0xe1   :  { %v340_v10 = vrot.slane %v862_v28, %v888_v51 }
  0xe2   :  { %v380_v23 = vsel %vm231_vm4, %v379_v7, %v375_v16 }
  0xe3   :  { %v864_v29 = vpop.xlane.xlu1 %168  ;;  %v341_v25 = vsel %vm231_vm4, %v340_v10, %v336_v17 }
  0xe4   :  { %v866_v30 = vpop.xlane.xlu0 %144  ;;  %v278_v26 = vrot.slane %v864_v29, %v888_v51 }
  0xe5   :  { %v230_v27 = vrot.slane %v866_v30, %v888_v51 }
  0xe6   :  { %v279_v44 = vsel %vm231_vm4, %v278_v26, %v274_v21 }
  0xe7   :  { %v868_v31 = vpop.xlane.xlu1 %123  ;;  %v232_v49 = vsel %vm231_vm4, %v230_v27, %v225_v22 }
  0xe8   :  { %v870_v33 = vpop.xlane.xlu0 %99  ;;  %v384_v13 = vrot.slane %v868_v31, %v891_v52 }
  0xe9   :  { %v345_v14 = vrot.slane %v870_v33, %v891_v52 }
  0xea   :  { %v385_v31 = vsel %vm238_vm5, %v384_v13, %v380_v23 }
  0xeb   :  { %v872_v34 = vpop.xlane.xlu1 %171  ;;  %v346_v32 = vsel %vm238_vm5, %v345_v14, %v341_v25 }
  0xec   :  { %v874_v36 = vpop.xlane.xlu0 %147  ;;  %v283_v33 = vrot.slane %v872_v34, %v891_v52 }
  0xed   :  { %v237_v35 = vrot.slane %v874_v36, %v891_v52 }
  0xef   :  { %v878_v40 = vpop.xlane.xlu1 %126 }
  0xf0   :  { %v880_v43 = vpop.xlane.xlu0 %102  ;;  %v389_v18 = vrot.slane %v878_v40, %v896_v54 }
  0xf1   :  { %v350_v19 = vrot.slane %v880_v43, %v896_v54 }
  0xf2   :  { %v390_v39 = vsel %vm245_vm6, %v389_v18, %v385_v31 }
  0xf3   :  { %v885_v50 = vpop.xlane.xlu1 %174  ;;  %v351_v29 = vsel %vm245_vm6, %v350_v19, %v346_v32 }
  0xf4   :  { %v893_v53 = vpop.xlane.xlu0 %150  ;;  %v288_v30 = vrot.slane %v885_v50, %v896_v54  ;;  %v284_v50 = vsel %vm238_vm5, %v283_v33, %v279_v44 }
  0xf5   :  { %v244_v42 = vrot.slane %v893_v53, %v896_v54  ;;  %v239_v53 = vsel %vm238_vm5, %v237_v35, %v232_v49 }
  0xf6   :  { %v289_v54 = vsel %vm245_vm6, %v288_v30, %v284_v50 }
  0xf7   :  { %v130_v63 = vpop.xlane.xlu1 %129 }
  0xf8   :  { %v106_v4 = vpop.xlane.xlu0 %105  ;;  %v394_v24 = vrot.slane %v130_v63, %v899_v55 }
  0xf9   :  { %v355_v28 = vrot.slane %v106_v4, %v899_v55 }
  0xfa   :  { %v395_v43 = vsel %vm252_vm7, %v394_v24, %v390_v39 }
  0xfb   :  { %v178_v15 = vpop.xlane.xlu1 %177  ;;  %v356_v45 = vsel %vm252_vm7, %v355_v28, %v351_v29 }
  0xfc   :  { %v154_v20 = vpop.xlane.xlu0 %153  ;;  %v293_v34 = vrot.slane %v178_v15, %v899_v55 }
  0xfd   :  { %v251_v46 = vrot.slane %v154_v20, %v899_v55  ;;  %v246_v55 = vsel %vm245_vm6, %v244_v42, %v239_v53 }
  0xfe   :  { %v294_v60 = vsel %vm252_vm7, %v293_v34, %v289_v54 }
  0xff   :  { %v133_v37 = vpop.xlane.xlu1 %132  ;;  %v253_v63 = vsel %vm252_vm7, %v251_v46, %v246_v55 }
 0x100   :  { %v399_v40 = vrot.slane %v133_v37, %v904_v58  ;;  %v109_v41 = vpop.xlane.xlu0 %108 }
 0x101   :  { %v360_v36 = vrot.slane %v109_v41, %v904_v58 }
 0x102   :  { %v400_v47 = vsel %vm259_vm8, %v399_v40, %v395_v43 }
 0x103   :  { %v361_v51 = vsel %vm259_vm8, %v360_v36, %v356_v45  ;;  %v181_v52 = vpop.xlane.xlu1 %180 }
 0x104   :  { %v401_v56 = vsel %vm300_vm9, %v400_v47, %v361_v51  ;;  %v298_v57 = vrot.slane %v181_v52, %v904_v58  ;;  %v157_v59 = vpop.xlane.xlu0 %156 }
 0x105   :  { %v403_v61 = vmax.f32 %v306_v48, %v401_v56  ;;  %v258_v62 = vrot.slane %v157_v59, %v904_v58 }
 0x106   :  { %v299_v0 = vsel %vm259_vm8, %v298_v57, %v294_v60 }
 0x107   :  { %404 = vst.msk [vmem:[#allocation2 + $0x2] sm:$0x3] %vm186_vm0, %v403_v61  ;;  %v260_v2 = vsel %vm259_vm8, %v258_v62, %v253_v63 }
 0x108   :  { %v301_v3 = vsel %vm300_vm9, %v299_v0, %v260_v2 }
 0x109   :  { %v303_v4 = vadd.f32 %v301_v3, %v189_v1 }
 0x10b   :  { %305 = vst.msk [vmem:[#allocation2] sm:$0x3] %vm186_vm0, %v303_v4 }
 0x112   :  { %v412_v7 = vld [vmem:[#allocation2] sm:$0xf] }
 0x113   :  { %v413_v58 = vmul.f32 %v412_v7, %v411_v6 }
 0x115   :  { %635 = vmatmul.mubr.msk.f32.vlgmr.msra.gmra.mrb[0].mxu0 %vm422_vm11, %v413_v58 }
 0x1e8   :  { %v492_v9 = vpop.f32.mrb[0].mxu0 }
 0x1e9   :  { %v496_v10 = vmax.f32 %v492_v9, 0.0  ;;  %v636_v11 = vpop.f32.mrb[1].mxu0 }
 0x1eb   :  { %640 = vmatmul.mubr.msk.f32.vlgmr.msra.gmra.mrb[0].mxu1 %vm498_vm13, %v496_v10 }
 0x2be   :  { %v572_v12 = vpop.f32.mrb[0].mxu1 }
 0x2bf   :  { %v577_v13 = vrot.slane %v572_v12, 2  ;;  %v641_v14 = vpop.f32.mrb[1].mxu1 }
 0x2c1   :  { %v579_v15 = vadd.f32 %v577_v13, %v572_v12 }
 0x2c3   :  { %v606_v16 = vmul.f32 -1.442695, %v579_v15 }
 0x2c5   :  { %667 = vpow2.f32 %v606_v16 }
 0x2cf   :  { %v668_v38 = vpop.eup %667 }
 0x2d0   :  { %v583_v17 = vadd.f32 1.0, %v668_v38 }
 0x2d2   :  { %669 = vrcp.f32 %v583_v17 }
 0x2dc   :  { %v670_v18 = vpop.eup %669 }
 0x2dd   :  { %586 = vst.msk [vmem:[#allocation9] sm:$0x3] %vm186_vm0, %v670_v18 }
 0x2de   :  { %748 = shalt.err (!%p745_p0)
}
 0x2df   :  { %s749_s27 = scalar_lea.hbm %s997_s3, 32 }
 0x2e0   :  { %p750_p1 = scmp.ne.s32.totalorder %s997_s3, %s749_s27  ;;  %p753_p2 = scmp.lt.u32.totalorder %s749_s27, %s997_s3 }
 0x2e2   :  { %p755_p3 = pnand %p753_p2, %p750_p1 }
 0x2e4   :  { %758 = shalt.err (!%p755_p3)
}
 0x2e5   :  { %596 = dma.vmem_to_hbm [thread:$0]  %s594_s23, 32, %s997_s3, [#allocation5]  }
 0x2e6   :  { %763 = dma.done.wait [#allocation5], 32  }
 0x2e7   :  { %764 = vsyncadd [#allocation5], 4294967264 }
 0x2e8   :  { %600 = vsyncpa [#allocation4], 1 }
 0x2e9   :  { %601 = vsyncpa [#allocation7], 1 }
 0x2ea   :  { %602 = vsyncpa [#allocation5], 1 }

</bundles_post_ra>
